<compile_context>
chip_gen: v6e
topology: v6e:2x2x1
jax: 0.10.0
libtpu: 0.0.40
codegen_flags: <defaults>
</compile_context>

<pallas_src>
import jax
import jax.numpy as jnp
import numpy as np
from jax.experimental import pallas as pl
from jax.experimental.pallas import tpu as pltpu

NEGATIVE_SLOPE = 0.01
BN_EPS = 1e-5


def _round_up(a, m):
    return (a + m - 1) // m * m


def _leaky_relu(x):
    # slope in (0, 1)  =>  leaky_relu(x) == max(x, slope * x)
    return jnp.maximum(x, NEGATIVE_SLOPE * x)


def discriminator_kernel(x_ref, lb_ref, w1_ref, b1_ref, w2_ref, b2_ref,
                         w3_ref, b3_ref, o_ref):
    # ---- layer 1: Linear (BN folded) + one-hot row-gather bias -> LeakyReLU ----
    h = jnp.dot(x_ref[...], w1_ref[...], preferred_element_type=jnp.float32)
    h = h + lb_ref[...] + b1_ref[...]
    h = _leaky_relu(h)                                   # Dropout = eval identity

    # ---- layer 2: Linear (BN folded) -> LeakyReLU ----
    h = jnp.dot(h.astype(w2_ref.dtype), w2_ref[...],
                preferred_element_type=jnp.float32)
    h = h + b2_ref[...]
    h = _leaky_relu(h)                                   # Dropout = eval identity

    # ---- layer 3: Linear(128 -> 1) as a lane reduction (avoids N=1 MXU matmul) ----
    logits = jnp.sum(h * w3_ref[...], axis=-1, keepdims=True) + b3_ref[0, 0]

    # Sigmoid via EUP exp + approximate reciprocal (both off the VPU critical path).
    o_ref[...] = pl.reciprocal(1.0 + jnp.exp(-logits), approx=True)


def make_raw_params(key, image_size, n_classes):
    """Deterministic synthetic parameters matching the PyTorch module shapes."""
    F = image_size + n_classes
    ks = jax.random.split(key, 12)

    def linear(kw, kb, fan_in, fan_out):
        bound = 1.0 / np.sqrt(fan_in)
        w = jax.random.uniform(kw, (fan_in, fan_out), jnp.float32, -bound, bound)
        b = jax.random.uniform(kb, (fan_out,), jnp.float32, -bound, bound)
        return w, b

    w1, b1 = linear(ks[0], ks[1], F, 128)
    w2, b2 = linear(ks[2], ks[3], 128, 128)
    w3, b3 = linear(ks[4], ks[5], 128, 1)

    return dict(
        w1=w1, b1=b1, w2=w2, b2=b2, w3=w3, b3=b3,
        # BatchNorm1d eval-mode parameters (non-trivial, deterministic)
        g1=1.0 + 0.05 * jax.random.normal(ks[6], (128,), jnp.float32),
        be1=0.05 * jax.random.normal(ks[7], (128,), jnp.float32),
        m1=0.1 * jax.random.normal(ks[8], (128,), jnp.float32),
        v1=1.0 + 0.1 * jax.random.uniform(ks[9], (128,), jnp.float32),
        g2=1.0 + 0.05 * jax.random.normal(ks[10], (128,), jnp.float32),
        be2=0.05 * jax.random.normal(ks[11], (128,), jnp.float32),
        m2=jnp.zeros((128,), jnp.float32),
        v2=jnp.ones((128,), jnp.float32),
    )


def prepare_params(raw, image_size, n_classes, matmul_dtype=jnp.bfloat16):
    """Fold BN into the Linears, split off the one-hot rows, pad K to 128 lanes."""

    def bn_fold(gamma, beta, mean, var):
        scale = gamma / jnp.sqrt(var + BN_EPS)
        shift = beta - mean * scale
        return scale, shift

    s1, t1 = bn_fold(raw["g1"], raw["be1"], raw["m1"], raw["v1"])
    s2, t2 = bn_fold(raw["g2"], raw["be2"], raw["m2"], raw["v2"])

    # y = (x @ W + b) * s + t  ==  x @ (W * s) + (b * s + t)
    w1f = raw["w1"] * s1[None, :]
    b1f = raw["b1"] * s1 + t1
    w2f = raw["w2"] * s2[None, :]
    b2f = raw["b2"] * s2 + t2

    # Split folded W1: image rows feed the MXU; one-hot rows become a row gather.
    k_pad = _round_up(image_size, 128)
    w1_img = jnp.zeros((k_pad, 128), jnp.float32).at[:image_size].set(w1f[:image_size])
    w1_cls = w1f[image_size:image_size + n_classes]      # (n_classes, 128), f32

    return dict(
        w1_img=w1_img.astype(matmul_dtype),
        w1_cls=w1_cls,
        b1=b1f.reshape(1, 128),
        w2=w2f.astype(matmul_dtype),
        b2=b2f.reshape(1, 128),
        w3_row=raw["w3"].reshape(1, 128),
        b3=raw["b3"].reshape(1, 1),
        k_pad=k_pad,
        matmul_dtype=matmul_dtype,
    )


def discriminator_forward(x, labels, packed, image_size, n_classes, tile_b=256):
    """Batch-tiled fused MLP. x: (B, ...) flattening to image_size, labels: (B,) int."""
    B = x.shape[0]
    k_pad = packed["k_pad"]
    mm_dtype = packed["matmul_dtype"]

    tile_b = _round_up(min(tile_b, _round_up(B, 8)), 8)
    b_pad = _round_up(B, tile_b)
    num_tiles = b_pad // tile_b

    x_flat = x.reshape(B, -1).astype(jnp.float32)
    # Zero-pad batch to a tile multiple and features to a lane-aligned K.
    x_p = jnp.zeros((b_pad, k_pad), mm_dtype).at[:B, :image_size].set(
        x_flat.astype(mm_dtype))

    # one-hot(labels) @ W1_cls is just a row gather -> per-sample bias (no concat).
    lb = packed["w1_cls"][labels]                          # (B, 128) f32
    lb = jnp.zeros((b_pad, 128), jnp.float32).at[:B].set(lb)

    def resident(shape):
        return pl.BlockSpec(shape, lambda i: (0, 0))       # stays in VMEM across tiles

    out = pl.pallas_call(
        discriminator_kernel,
        out_shape=jax.ShapeDtypeStruct((b_pad, 1), jnp.float32),
        grid=(num_tiles,),
        in_specs=[
            pl.BlockSpec((tile_b, k_pad), lambda i: (i, 0)),   # x tile (pipelined)
            pl.BlockSpec((tile_b, 128), lambda i: (i, 0)),     # label-bias tile
            resident((k_pad, 128)),                            # W1 (BN-folded, padded)
            resident((1, 128)),                                # b1 (BN-folded)
            resident((128, 128)),                              # W2 (BN-folded)
            resident((1, 128)),                                # b2 (BN-folded)
            resident((1, 128)),                                # w3 as a lane row
            pl.BlockSpec(memory_space=pltpu.MemorySpace.SMEM),  # b3 scalar
        ],
        out_specs=pl.BlockSpec((tile_b, 1), lambda i: (i, 0)),
        compiler_params=pltpu.CompilerParams(
            dimension_semantics=("parallel",),                 # megacore on v7x
        ),
    )(x_p, lb, packed["w1_img"], packed["b1"], packed["w2"], packed["b2"],
      packed["w3_row"], packed["b3"])

    return out[:B]


def reference_forward(x, labels, raw, n_classes):
    """Pure-JAX f32 reference matching the PyTorch module in eval mode."""
    B = x.shape[0]
    x_flat = x.reshape(B, -1).astype(jnp.float32)
    onehot = jnp.eye(n_classes, dtype=jnp.float32)[labels]
    h = jnp.concatenate([x_flat, onehot], axis=1)

    def bn(v, g, be, m, var):
        return (v - m) / jnp.sqrt(var + BN_EPS) * g + be

    h = h @ raw["w1"] + raw["b1"]
    h = bn(h, raw["g1"], raw["be1"], raw["m1"], raw["v1"])
    h = jnp.where(h >= 0, h, NEGATIVE_SLOPE * h)
    h = h @ raw["w2"] + raw["b2"]
    h = bn(h, raw["g2"], raw["be2"], raw["m2"], raw["v2"])
    h = jnp.where(h >= 0, h, NEGATIVE_SLOPE * h)
    logits = h @ raw["w3"] + raw["b3"]
    return jax.nn.sigmoid(logits)


if __name__ == "__main__":
    B = 8
    image_size = 64          # flattened 1x8x8 image
    n_classes = 10

    key = jax.random.PRNGKey(0)
    kx, kl, kp = jax.random.split(key, 3)

    x = jax.random.normal(kx, (B, 1, 8, 8), jnp.float32)
    labels = jax.random.randint(kl, (B,), 0, n_classes)

    raw = make_raw_params(kp, image_size, n_classes)
    packed = prepare_params(raw, image_size, n_classes, matmul_dtype=jnp.bfloat16)

    out = discriminator_forward(x, labels, packed, image_size, n_classes)
    out = jax.block_until_ready(out)

    ref = reference_forward(x, labels, raw, n_classes)
    assert out.shape == (B, 1)
    # bf16 matmul operands (f32 accumulation) => relaxed tolerance vs f32 reference.
    np.testing.assert_allclose(np.asarray(out), np.asarray(ref), rtol=2e-2, atol=2e-2)

    print("KERNEL_OK")
</pallas_src>

<mosaic_0001>
module attributes {stable_mosaic.version = 11 : i64} {
  func.func @discriminator_kernel(%arg0: i32, %arg1: memref<8x128xbf16, #tpu.memory_space<vmem>>, %arg2: memref<8x128xf32, #tpu.memory_space<vmem>>, %arg3: memref<128x128xbf16, #tpu.memory_space<vmem>>, %arg4: memref<1x128xf32, #tpu.memory_space<vmem>>, %arg5: memref<128x128xbf16, #tpu.memory_space<vmem>>, %arg6: memref<1x128xf32, #tpu.memory_space<vmem>>, %arg7: memref<1x128xf32, #tpu.memory_space<vmem>>, %arg8: memref<1x1xf32, #tpu.memory_space<smem>>, %arg9: memref<8x1xf32, #tpu.memory_space<vmem>>) attributes {dimension_semantics = [#tpu.dimension_semantics<parallel>], iteration_bounds = array<i64: 1>, scalar_prefetch = 0 : i64, scratch_operands = 0 : i64, tpu.core_type = #tpu.core_type<tc>, window_params = [{transform_indices = @transform_0, window_bounds = array<i64: 8, 128>}, {transform_indices = @transform_1, window_bounds = array<i64: 8, 128>}, {pipeline_mode = #tpu.pipeline_mode<synchronous>, transform_indices = @transform_2, window_bounds = array<i64: 128, 128>}, {pipeline_mode = #tpu.pipeline_mode<synchronous>, transform_indices = @transform_3, window_bounds = array<i64: 1, 128>}, {pipeline_mode = #tpu.pipeline_mode<synchronous>, transform_indices = @transform_4, window_bounds = array<i64: 128, 128>}, {pipeline_mode = #tpu.pipeline_mode<synchronous>, transform_indices = @transform_5, window_bounds = array<i64: 1, 128>}, {pipeline_mode = #tpu.pipeline_mode<synchronous>, transform_indices = @transform_6, window_bounds = array<i64: 1, 128>}, {transform_indices = @transform_7, window_bounds = array<i64: 1, 1>}, {transform_indices = @transform_8, window_bounds = array<i64: 8, 1>}]} {
    %c0 = arith.constant 0 : index
    %c0_0 = arith.constant 0 : index
    %0 = vector.load %arg1[%c0, %c0_0] : memref<8x128xbf16, #tpu.memory_space<vmem>>, vector<8x128xbf16>
    %c0_1 = arith.constant 0 : index
    %c0_2 = arith.constant 0 : index
    %1 = vector.load %arg3[%c0_1, %c0_2] : memref<128x128xbf16, #tpu.memory_space<vmem>>, vector<128x128xbf16>
    %cst = arith.constant dense<0.000000e+00> : vector<8x128xf32>
    %2 = tpu.matmul %0, %1, %cst {dimension_numbers = #tpu.dot_dimension_numbers<[1], [0], [0], [1], [0, 0, 1, 1], [], []>} : vector<8x128xbf16>, vector<128x128xbf16>, vector<8x128xf32> -> vector<8x128xf32>
    %c0_3 = arith.constant 0 : index
    %c0_4 = arith.constant 0 : index
    %3 = vector.load %arg2[%c0_3, %c0_4] : memref<8x128xf32, #tpu.memory_space<vmem>>, vector<8x128xf32>
    %4 = arith.addf %2, %3 : vector<8x128xf32>
    %c0_5 = arith.constant 0 : index
    %c0_6 = arith.constant 0 : index
    %5 = vector.load %arg4[%c0_5, %c0_6] : memref<1x128xf32, #tpu.memory_space<vmem>>, vector<1x128xf32>
    %6 = vector.broadcast %5 : vector<1x128xf32> to vector<8x128xf32>
    %7 = arith.addf %4, %6 : vector<8x128xf32>
    %cst_7 = arith.constant 0.00999999977 : f32
    %8 = vector.broadcast %cst_7 : f32 to vector<8x128xf32>
    %9 = arith.mulf %8, %7 : vector<8x128xf32>
    %10 = arith.maximumf %7, %9 : vector<8x128xf32>
    %11 = arith.truncf %10 : vector<8x128xf32> to vector<8x128xbf16>
    %c0_8 = arith.constant 0 : index
    %c0_9 = arith.constant 0 : index
    %12 = vector.load %arg5[%c0_8, %c0_9] : memref<128x128xbf16, #tpu.memory_space<vmem>>, vector<128x128xbf16>
    %cst_10 = arith.constant dense<0.000000e+00> : vector<8x128xf32>
    %13 = tpu.matmul %11, %12, %cst_10 {dimension_numbers = #tpu.dot_dimension_numbers<[1], [0], [0], [1], [0, 0, 1, 1], [], []>} : vector<8x128xbf16>, vector<128x128xbf16>, vector<8x128xf32> -> vector<8x128xf32>
    %c0_11 = arith.constant 0 : index
    %c0_12 = arith.constant 0 : index
    %14 = vector.load %arg6[%c0_11, %c0_12] : memref<1x128xf32, #tpu.memory_space<vmem>>, vector<1x128xf32>
    %15 = vector.broadcast %14 : vector<1x128xf32> to vector<8x128xf32>
    %16 = arith.addf %13, %15 : vector<8x128xf32>
    %cst_13 = arith.constant 0.00999999977 : f32
    %17 = vector.broadcast %cst_13 : f32 to vector<8x128xf32>
    %18 = arith.mulf %17, %16 : vector<8x128xf32>
    %19 = arith.maximumf %16, %18 : vector<8x128xf32>
    %c0_14 = arith.constant 0 : index
    %c0_15 = arith.constant 0 : index
    %20 = vector.load %arg7[%c0_14, %c0_15] : memref<1x128xf32, #tpu.memory_space<vmem>>, vector<1x128xf32>
    %21 = vector.broadcast %20 : vector<1x128xf32> to vector<8x128xf32>
    %22 = arith.mulf %19, %21 : vector<8x128xf32>
    %cst_16 = arith.constant dense<0.000000e+00> : vector<8xf32>
    %23 = vector.multi_reduction <add>, %22, %cst_16 [1] : vector<8x128xf32> to vector<8xf32>
    %24 = vector.shape_cast %23 : vector<8xf32> to vector<8x1xf32>
    %c0_17 = arith.constant 0 : index
    %c0_18 = arith.constant 0 : index
    %25 = memref.load %arg8[%c0_17, %c0_18] : memref<1x1xf32, #tpu.memory_space<smem>>
    %26 = vector.broadcast %25 : f32 to vector<8x1xf32>
    %27 = arith.addf %24, %26 : vector<8x1xf32>
    %cst_19 = arith.constant 0.000000e+00 : f32
    %28 = vector.broadcast %cst_19 : f32 to vector<8x1xf32>
    %29 = arith.subf %28, %27 : vector<8x1xf32>
    %30 = math.exp %29 : vector<8x1xf32>
    %cst_20 = arith.constant 1.000000e+00 : f32
    %31 = vector.broadcast %cst_20 : f32 to vector<8x1xf32>
    %32 = arith.addf %31, %30 : vector<8x1xf32>
    %33 = tpu.reciprocal %32 {approx = true} : vector<8x1xf32> -> vector<8x1xf32>
    %c0_21 = arith.constant 0 : index
    %c0_22 = arith.constant 0 : index
    %34 = vector.load %arg9[%c0_21, %c0_22] : memref<8x1xf32, #tpu.memory_space<vmem>>, vector<8x1xf32>
    tpu.vector_store %arg9[%c0_21, %c0_22], %33 {strides = array<i32>} : memref<8x1xf32, #tpu.memory_space<vmem>>, vector<8x1xf32>,
    return
  }
  func.func @transform_0(%arg0: i32) -> (i32, i32) {
    %c0_i32 = arith.constant 0 : i32
    %c0_i32_0 = arith.constant 0 : i32
    return %arg0, %c0_i32 : i32, i32
  }
  func.func @transform_1(%arg0: i32) -> (i32, i32) {
    %c0_i32 = arith.constant 0 : i32
    %c0_i32_0 = arith.constant 0 : i32
    return %arg0, %c0_i32 : i32, i32
  }
  func.func @transform_2(%arg0: i32) -> (i32, i32) {
    %c0_i32 = arith.constant 0 : i32
    %c0_i32_0 = arith.constant 0 : i32
    %c0_i32_1 = arith.constant 0 : i32
    return %c0_i32, %c0_i32_0 : i32, i32
  }
  func.func @transform_3(%arg0: i32) -> (i32, i32) {
    %c0_i32 = arith.constant 0 : i32
    %c0_i32_0 = arith.constant 0 : i32
    %c0_i32_1 = arith.constant 0 : i32
    return %c0_i32, %c0_i32_0 : i32, i32
  }
  func.func @transform_4(%arg0: i32) -> (i32, i32) {
    %c0_i32 = arith.constant 0 : i32
    %c0_i32_0 = arith.constant 0 : i32
    %c0_i32_1 = arith.constant 0 : i32
    return %c0_i32, %c0_i32_0 : i32, i32
  }
  func.func @transform_5(%arg0: i32) -> (i32, i32) {
    %c0_i32 = arith.constant 0 : i32
    %c0_i32_0 = arith.constant 0 : i32
    %c0_i32_1 = arith.constant 0 : i32
    return %c0_i32, %c0_i32_0 : i32, i32
  }
  func.func @transform_6(%arg0: i32) -> (i32, i32) {
    %c0_i32 = arith.constant 0 : i32
    %c0_i32_0 = arith.constant 0 : i32
    %c0_i32_1 = arith.constant 0 : i32
    return %c0_i32, %c0_i32_0 : i32, i32
  }
  func.func @transform_7(%arg0: i32) -> (i32, i32) {
    %c0_i32 = arith.constant 0 : i32
    %c0_i32_0 = arith.constant 0 : i32
    %c0_i32_1 = arith.constant 0 : i32
    return %c0_i32, %c0_i32_0 : i32, i32
  }
  func.func @transform_8(%arg0: i32) -> (i32, i32) {
    %c0_i32 = arith.constant 0 : i32
    %c0_i32_0 = arith.constant 0 : i32
    return %arg0, %c0_i32 : i32, i32
  }
}

</mosaic_0001>

<bundles_post_ra>
// kernel: tpu_custom_call.1
= control target key start
LH: loop header
LB: loop body
LE: loop exit
PB: predicated region body
PF: predicated region fallthrough
CT: control target
= control target key end

     0   :  { %14 = vsyncpa [#allocation4], 0  ;;  %s610_s0 = inlined_call_operand.hbm [shape: bf16[8,128], index: 0, kind: input, shape index: {}]   ;;  %s611_s1 = inlined_call_operand.hbm [shape: f32[8,128], index: 1, kind: input, shape index: {}]   ;;  %s612_s2 = inlined_call_operand.hbm [shape: bf16[128,128], index: 2, kind: input, shape index: {}]   ;;  %s613_s3 = inlined_call_operand.vmem [shape: f32[1,128], index: 3, kind: input, shape index: {}]   ;;  %s614_s4 = inlined_call_operand.hbm [shape: bf16[128,128], index: 4, kind: input, shape index: {}]   ;;  %s615_s5 = inlined_call_operand.vmem [shape: f32[1,128], index: 5, kind: input, shape index: {}]   ;;  %s616_s6 = inlined_call_operand.vmem [shape: f32[1,128], index: 6, kind: input, shape index: {}]   ;;  %s617_s7 = inlined_call_operand.<no memory space> [shape: f32[1,1], index: 7, kind: input, shape index: {}]   ;;  %s618_s8 = inlined_call_operand.vmem [shape: f32[8,1], index: 8, kind: output, shape index: {}]  }
   0x1   :  { %15 = vsyncpa [#allocation6], 0 }
   0x2   :  { %16 = vsyncpa [#allocation9], 0  ;;  %s530_s27 = smov [#allocation5]   ;;  %s531_s29 = smov [#allocation3]  }
   0x3   :  { %s33_s28 = sshll.u32 %s530_s27, 4  ;;  %s23_s30 = sshll.u32 %s531_s29, 4  ;;  %s34_s28 = int_to_ptr.vmem [resolvable:$true] %s33_s28  ;;  %s24_s30 = int_to_ptr.vmem [resolvable:$true] %s23_s30 }
   0x4   :  { %s452_s9 = scalar_lea.vmem %s34_s28, 128  ;;  %p457_p1 = scmp.lt.s32.totalorder %s34_s28, %s34_s28 }
   0x5   :  { %p453_p0 = scmp.ne.s32.totalorder %s34_s28, %s452_s9  ;;  %p458_p2 = scmp.lt.s32.totalorder %s452_s9, %s452_s9 }
   0x7   :  { %p459_p3 = por %p458_p2, %p457_p1 }
   0x9   :  { %p460_p4 = pnand %p459_p3, %p453_p0 }
   0xb   :  { %463 = shalt.err (!%p460_p4)
}
   0xc   :  { %36 = dma.hbm_to_vmem [thread:$0]  %s611_s1, 128, %s34_s28, [#allocation6]  }
   0xd   :  { %s472_s12 = scalar_lea.vmem %s24_s30, 64  ;;  %p477_p6 = scmp.lt.s32.totalorder %s24_s30, %s24_s30 }
   0xe   :  { %p473_p5 = scmp.ne.s32.totalorder %s24_s30, %s472_s12  ;;  %p478_p7 = scmp.lt.s32.totalorder %s472_s12, %s472_s12 }
  0x10   :  { %p479_p8 = por %p478_p7, %p477_p6 }
  0x12   :  { %p480_p9 = pnand %p479_p8, %p473_p5 }
  0x14   :  { %483 = shalt.err (!%p480_p9)
}
  0x15   :  { %26 = dma.hbm_to_vmem [thread:$0]  %s610_s0, 64, %s24_s30, [#allocation4]  }
  0x16   :  { %s532_s15 = smov [#allocation7]  }
  0x17   :  { %s42_s16 = sshll.u32 %s532_s15, 4  ;;  %s43_s16 = int_to_ptr.vmem [resolvable:$true] %s42_s16 }
  0x18   :  { %s492_s17 = scalar_lea.vmem %s43_s16, 1024  ;;  %p497_p11 = scmp.lt.s32.totalorder %s43_s16, %s43_s16 }
  0x19   :  { %p493_p10 = scmp.ne.s32.totalorder %s43_s16, %s492_s17  ;;  %p498_p12 = scmp.lt.s32.totalorder %s492_s17, %s492_s17 }
  0x1b   :  { %p499_p13 = por %p498_p12, %p497_p11 }
  0x1d   :  { %p500_p0 = pnand %p499_p13, %p493_p10 }
  0x1f   :  { %503 = shalt.err (!%p500_p0)
}
  0x20   :  { %s533_s1 = smov 64   ;;  %s534_s18 = smov 4  }
  0x21   :  { %48 = dma.hbm_to_vmem [thread:$0]  %s612_s2, 1024, %s43_s16, [#allocation6], %s533_s1, %s533_s1, %s534_s18  }
  0x22   :  { %s535_s21 = smov [#allocation8]  }
  0x23   :  { %s56_s22 = sshll.u32 %s535_s21, 4  ;;  %s57_s22 = int_to_ptr.vmem [resolvable:$true] %s56_s22 }
  0x24   :  { %s512_s0 = scalar_lea.vmem %s57_s22, 1024  ;;  %p517_p2 = scmp.lt.s32.totalorder %s57_s22, %s57_s22 }
  0x25   :  { %p513_p1 = scmp.ne.s32.totalorder %s57_s22, %s512_s0  ;;  %p518_p3 = scmp.lt.s32.totalorder %s512_s0, %s512_s0 }
  0x27   :  { %p519_p4 = por %p518_p3, %p517_p2 }
  0x29   :  { %p520_p5 = pnand %p519_p4, %p513_p1 }
  0x2b   :  { %523 = shalt.err (!%p520_p5)
}
  0x2c   :  { %62 = dma.hbm_to_vmem [thread:$0]  %s614_s4, 1024, %s57_s22, [#allocation9], %s533_s1, %s533_s1, %s534_s18  }
  0x2d   :  { %524 = dma.done.wait [#allocation4], 64  }
  0x2e   :  { %525 = vsyncadd [#allocation4], 4294967232 }
  0x2f   :  { %526 = dma.done.wait [#allocation6], 1152  }
  0x30   :  { %527 = vsyncadd [#allocation6], 4294966144 }
  0x31   :  { %528 = dma.done.wait [#allocation9], 1024  }
  0x32   :  { %529 = vsyncadd [#allocation9], 4294966272  ;;  %v536_v0 = vmov 0.0   ;;  %vm537_vm0 = vmmov 0   ;;  %v424_v1 = vld [vmem:[#allocation7 + $0x38] sm:$0xff]   ;;  %v425_v2 = vld [vmem:[#allocation7 + $0x30] sm:$0xff]   ;;  %v323_v39 = vstv %s617_s7 }
  0x33   :  { %376 = vmatprep.subr.bf16.mxu0 %v536_v0  ;;  %392 = vmatprep.mubr.msk.bf16.mxu0 %vm537_vm0, %v536_v0  ;;  %v426_v3 = vld [vmem:[#allocation7 + $0x28] sm:$0xff]   ;;  %v432_v4 = vld [vmem:[#allocation8 + $0x38] sm:$0xff]   ;;  %v427_v5 = vld [vmem:[#allocation7 + $0x20] sm:$0xff]   ;;  %vm330_vm1 = vcmask 7168  }
  0x34   :  { %396 = vmatprep.subr.bf16.mxu1 %v536_v0  ;;  %412 = vmatprep.mubr.msk.bf16.mxu1 %vm537_vm0, %v536_v0  ;;  %v433_v6 = vld [vmem:[#allocation8 + $0x30] sm:$0xff]   ;;  %v428_v7 = vld [vmem:[#allocation7 + $0x18] sm:$0xff]   ;;  %v434_v8 = vld [vmem:[#allocation8 + $0x28] sm:$0xff]  }
  0x35   :  { %377 = vmatpush3.bf16.msra.mxu0 %v424_v1  ;;  %397 = vmatpush3.bf16.msra.mxu1 %v432_v4  ;;  %v429_v9 = vld [vmem:[#allocation7 + $0x10] sm:$0xff]   ;;  %v435_v10 = vld [vmem:[#allocation8 + $0x20] sm:$0xff]   ;;  %v430_v11 = vld [vmem:[#allocation7 + $0x8] sm:$0xff]  }
  0x36   :  { %378 = vmatprep.subr.bf16.mxu0 %v536_v0  ;;  %398 = vmatprep.subr.bf16.mxu1 %v536_v0  ;;  %v436_v12 = vld [vmem:[#allocation8 + $0x18] sm:$0xff]   ;;  %v431_v13 = vld [vmem:[#allocation7] sm:$0xff]   ;;  %v82_v14 = vld [vmem:[#allocation3] sm:$0xf] }
  0x37   :  { %v437_v15 = vld [vmem:[#allocation8 + $0x10] sm:$0xff]   ;;  %v438_v16 = vld [vmem:[#allocation8 + $0x8] sm:$0xff]   ;;  %v439_v17 = vld [vmem:[#allocation8] sm:$0xff]  }
  0x38   :  { %v99_v18 = vld [vmem:[#allocation5] sm:$0xff]  ;;  %v347_v20 = vld [vmem:[%s613_s3] ss:$0 sm:$0xff] }
  0x39   :  { %379 = vmatpush3.bf16.msra.mxu0 %v425_v2  ;;  %399 = vmatpush3.bf16.msra.mxu1 %v433_v6  ;;  %v348_v29 = vld [vmem:[%s615_s5] ss:$0 sm:$0xff] }
  0x3a   :  { %380 = vmatprep.subr.bf16.mxu0 %v536_v0  ;;  %400 = vmatprep.subr.bf16.mxu1 %v536_v0  ;;  %v357_v35 = vld [vmem:[%s616_s6] ss:$0 sm:$0xff] }
  0x3d   :  { %381 = vmatpush3.bf16.msra.mxu0 %v426_v3  ;;  %401 = vmatpush3.bf16.msra.mxu1 %v434_v8 }
  0x3e   :  { %382 = vmatprep.subr.bf16.mxu0 %v536_v0  ;;  %402 = vmatprep.subr.bf16.mxu1 %v536_v0 }
  0x41   :  { %383 = vmatpush3.bf16.msra.mxu0 %v427_v5  ;;  %403 = vmatpush3.bf16.msra.mxu1 %v435_v10 }
  0x42   :  { %384 = vmatprep.subr.bf16.mxu0 %v536_v0  ;;  %404 = vmatprep.subr.bf16.mxu1 %v536_v0 }
  0x45   :  { %385 = vmatpush3.bf16.msra.mxu0 %v428_v7  ;;  %405 = vmatpush3.bf16.msra.mxu1 %v436_v12 }
  0x46   :  { %386 = vmatprep.subr.bf16.mxu0 %v536_v0  ;;  %406 = vmatprep.subr.bf16.mxu1 %v536_v0 }
  0x49   :  { %387 = vmatpush3.bf16.msra.mxu0 %v429_v9  ;;  %407 = vmatpush3.bf16.msra.mxu1 %v437_v15 }
  0x4a   :  { %388 = vmatprep.subr.bf16.mxu0 %v536_v0  ;;  %408 = vmatprep.subr.bf16.mxu1 %v536_v0 }
  0x4d   :  { %389 = vmatpush3.bf16.msra.mxu0 %v430_v11  ;;  %409 = vmatpush3.bf16.msra.mxu1 %v438_v16 }
  0x4e   :  { %390 = vmatprep.subr.bf16.mxu0 %v536_v0  ;;  %410 = vmatprep.subr.bf16.mxu1 %v536_v0 }
  0x51   :  { %391 = vmatpush3.bf16.msra.mxu0 %v431_v13  ;;  %411 = vmatpush3.bf16.msra.mxu1 %v439_v17 }
  0x54   :  { %393 = vmatmul.mubr.bf16.vlgmr.msra.gmra.mxu0 %v82_v14 }
 0x114   :  { %v182_v19 = vpop.f32.mrf.mxu0 }
 0x115   :  { %v183_v21 = vadd.f32 %v182_v19, %v99_v18 }
 0x116   :  { %v394_v22 = vpop.f32.mrf.mxu0 }
 0x117   :  { %v195_v23 = vadd.f32 %v347_v20, %v183_v21 }
 0x118   :  { %v185_v24 = vpop.f32.mrf.mxu0 }
 0x119   :  { %v196_v25 = vmul.f32 0.01, %v195_v23 }
 0x11a   :  { %v395_v26 = vpop.f32.mrf.mxu0 }
 0x11b   :  { %v197_v27 = vmax.f32 %v195_v23, %v196_v25 }
 0x11d   :  { %v198_v28 = vpack.c.bf16 %v197_v27, %v197_v27 }
 0x11f   :  { %413 = vmatmul.mubr.bf16.vlgmr.msra.gmra.mxu1 %v198_v28 }
 0x1df   :  { %v304_v30 = vpop.f32.mrf.mxu1 }
 0x1e0   :  { %v305_v31 = vadd.f32 %v348_v29, %v304_v30 }
 0x1e1   :  { %v414_v32 = vpop.f32.mrf.mxu1 }
 0x1e2   :  { %v310_v33 = vmul.f32 0.01, %v305_v31 }
 0x1e3   :  { %v307_v34 = vpop.f32.mrf.mxu1 }
 0x1e4   :  { %v311_v36 = vmax.f32 %v305_v31, %v310_v33 }
 0x1e5   :  { %v415_v37 = vpop.f32.mrf.mxu1 }
 0x1e6   :  { %v319_v38 = vmul.f32 %v357_v35, %v311_v36 }
 0x1e8   :  { %320 = vadd.xlane.f32.xlu0 %v319_v38 }
 0x271   :  { %v321_v40 = vpop.xlane.xlu0 %320 }
 0x272   :  { %v324_v41 = vadd.f32 %v323_v39, %v321_v40 }
 0x274   :  { %v325_v42 = vsub.f32 0.0, %v324_v41 }
 0x276   :  { %v326_v43 = vmul.f32 1.442695, %v325_v42 }
 0x278   :  { %440 = vpow2.f32 %v326_v43 }
 0x285   :  { %v441_v44 = vpop.eup %440 }
 0x286   :  { %v328_v45 = vadd.f32 1.0, %v441_v44 }
 0x288   :  { %442 = vrcp.f32 %v328_v45 }
 0x295   :  { %v443_v46 = vpop.eup %442 }
 0x296   :  { %331 = vst.msk [vmem:[%s618_s8] sm:$0xff] %vm330_vm1, %v443_v46 }
 0x297   :  { %336 = vsyncpa [#allocation4], 1 }
 0x298   :  { %337 = vsyncpa [#allocation6], 1 }
 0x299   :  { %338 = vsyncpa [#allocation9], 1 }

</bundles_post_ra>
